<compile_context>
chip_gen: v6e
topology: v6e:2x2x1
jax: 0.10.0
libtpu: 0.0.40
codegen_flags: <defaults>
</compile_context>

<pallas_src>
import functools

import jax
import jax.numpy as jnp
from jax import lax
from jax.experimental import pallas as pl
from jax.experimental.pallas import tpu as pltpu

_VMEM_LIMIT = 32 * 1024 * 1024  # safe on v5e/v6e/v7x (<= default scoped limit on v6e/v7x)


def _pick_tile(dim, target, align):
    """Largest tile <= target that divides `dim` and respects `align`; else full dim."""
    if dim <= target:
        return dim
    t = target
    while t >= align:
        if dim % t == 0:
            return t
        t //= 2
    return dim


# ---------------------------------------------------------------------------
# Kernels
# ---------------------------------------------------------------------------
def _head_proj_kernel(x_ref, w_ref, o_ref, acc_ref, *, out_scale=1.0):
    """y[b, h, n, :] = (x[b, n, :] @ w[h, :, :]) * out_scale, tiled over K."""
    k_step = pl.program_id(3)

    @pl.when(k_step == 0)
    def _():
        acc_ref[...] = jnp.zeros(acc_ref.shape, acc_ref.dtype)

    acc_ref[...] += jnp.dot(x_ref[0], w_ref[0], preferred_element_type=jnp.float32)

    @pl.when(k_step == pl.num_programs(3) - 1)
    def _():
        acc = acc_ref[...]
        if out_scale != 1.0:           # static python branch (scale folded into q once)
            acc = acc * out_scale
        o_ref[0, 0] = acc.astype(o_ref.dtype)


def _kv_proj_kernel(x_ref, wk_ref, wv_ref, k_out_ref, v_out_ref, acck_ref, accv_ref):
    """k/v projections share one read of the context activation."""
    k_step = pl.program_id(3)

    @pl.when(k_step == 0)
    def _():
        acck_ref[...] = jnp.zeros(acck_ref.shape, acck_ref.dtype)
        accv_ref[...] = jnp.zeros(accv_ref.shape, accv_ref.dtype)

    x = x_ref[0]
    acck_ref[...] += jnp.dot(x, wk_ref[0], preferred_element_type=jnp.float32)
    accv_ref[...] += jnp.dot(x, wv_ref[0], preferred_element_type=jnp.float32)

    @pl.when(k_step == pl.num_programs(3) - 1)
    def _():
        k_out_ref[0, 0] = acck_ref[...].astype(k_out_ref.dtype)
        v_out_ref[0, 0] = accv_ref[...].astype(v_out_ref.dtype)


def _flash_attn_kernel(q_ref, k_ref, v_ref, o_ref, m_ref, l_ref, acc_ref):
    """Online-softmax attention over KV tiles.  q is pre-scaled by dim_head**-0.5."""
    ki = pl.program_id(3)

    @pl.when(ki == 0)
    def _():
        m_ref[...] = jnp.full(m_ref.shape, -jnp.inf, m_ref.dtype)
        l_ref[...] = jnp.zeros(l_ref.shape, l_ref.dtype)
        acc_ref[...] = jnp.zeros(acc_ref.shape, acc_ref.dtype)

    q = q_ref[0, 0]                                   # [tq, dh]
    k = k_ref[0, 0]                                   # [tkv, dh]
    v = v_ref[0, 0]                                   # [tkv, dh]

    # QK^T without materializing k.T: contract the last dim of both.
    s = lax.dot_general(q, k, dimension_numbers=(((1,), (1,)), ((), ())),
                        preferred_element_type=jnp.float32)        # [tq, tkv]

    m_prev = m_ref[...]
    m_new = jnp.maximum(m_prev, jnp.max(s, axis=-1, keepdims=True))
    alpha = jnp.exp(m_prev - m_new)
    p = jnp.exp(s - m_new)

    l_ref[...] = alpha * l_ref[...] + jnp.sum(p, axis=-1, keepdims=True)
    acc_ref[...] = alpha * acc_ref[...] + jnp.dot(
        p.astype(v.dtype), v, preferred_element_type=jnp.float32)
    m_ref[...] = m_new

    @pl.when(ki == pl.num_programs(3) - 1)
    def _():
        inv_l = pl.reciprocal(l_ref[...], approx=True)   # EUP slot, essentially free
        o_ref[0, 0] = (acc_ref[...] * inv_l).astype(o_ref.dtype)


def _merge_out_kernel(x_ref, w_ref, b_ref, o_ref, acc_ref):
    """to_out: y[b, n, :] = sum_h attn_out[b, h, n, :] @ wo[h, :, :] + bo (bias on last step)."""
    hd = pl.program_id(3)

    @pl.when(hd == 0)
    def _():
        acc_ref[...] = jnp.zeros(acc_ref.shape, acc_ref.dtype)

    acc_ref[...] += jnp.dot(x_ref[0, 0], w_ref[0], preferred_element_type=jnp.float32)

    @pl.when(hd == pl.num_programs(3) - 1)
    def _():
        o_ref[0] = (acc_ref[...] + b_ref[...]).astype(o_ref.dtype)


# ---------------------------------------------------------------------------
# pallas_call wrappers
# ---------------------------------------------------------------------------
def per_head_projection(x, w_h, *, out_scale=1.0, seq_tile=256, k_tile=512):
    """x: [B, N, Din], w_h: [H, Din, dh] -> [B, H, N, dh]."""
    B, N, Din = x.shape
    H, _, dh = w_h.shape
    tn = _pick_tile(N, seq_tile, 8)
    tk = _pick_tile(Din, k_tile, 128)
    grid = (B, H, N // tn, Din // tk)
    cost = pl.CostEstimate(
        flops=2 * B * H * N * Din * dh, transcendentals=0,
        bytes_accessed=4 * (B * N * Din + H * Din * dh + B * H * N * dh))
    return pl.pallas_call(
        functools.partial(_head_proj_kernel, out_scale=out_scale),
        out_shape=jax.ShapeDtypeStruct((B, H, N, dh), x.dtype),
        grid=grid,
        in_specs=[
            pl.BlockSpec((1, tn, tk), lambda b, hd, ni, ki: (b, ni, ki)),
            pl.BlockSpec((1, tk, dh), lambda b, hd, ni, ki: (hd, ki, 0)),
        ],
        out_specs=pl.BlockSpec((1, 1, tn, dh), lambda b, hd, ni, ki: (b, hd, ni, 0)),
        scratch_shapes=[pltpu.VMEM((tn, dh), jnp.float32)],
        compiler_params=pltpu.CompilerParams(
            dimension_semantics=("parallel", "parallel", "parallel", "arbitrary"),
            vmem_limit_bytes=_VMEM_LIMIT),
        cost_estimate=cost,
    )(x, w_h)


def kv_projection(ctx, wk_h, wv_h, *, seq_tile=256, k_tile=512):
    """ctx: [B, Nk, Dc], wk_h/wv_h: [H, Dc, dh] -> (k, v) each [B, H, Nk, dh]."""
    B, N, Din = ctx.shape
    H, _, dh = wk_h.shape
    tn = _pick_tile(N, seq_tile, 8)
    tk = _pick_tile(Din, k_tile, 128)
    grid = (B, H, N // tn, Din // tk)
    out_sd = jax.ShapeDtypeStruct((B, H, N, dh), ctx.dtype)
    cost = pl.CostEstimate(
        flops=4 * B * H * N * Din * dh, transcendentals=0,
        bytes_accessed=4 * (B * N * Din + 2 * H * Din * dh + 2 * B * H * N * dh))
    w_spec = pl.BlockSpec((1, tk, dh), lambda b, hd, ni, ki: (hd, ki, 0))
    o_spec = pl.BlockSpec((1, 1, tn, dh), lambda b, hd, ni, ki: (b, hd, ni, 0))
    return pl.pallas_call(
        _kv_proj_kernel,
        out_shape=(out_sd, out_sd),
        grid=grid,
        in_specs=[
            pl.BlockSpec((1, tn, tk), lambda b, hd, ni, ki: (b, ni, ki)),
            w_spec, w_spec,
        ],
        out_specs=(o_spec, o_spec),
        scratch_shapes=[pltpu.VMEM((tn, dh), jnp.float32),
                        pltpu.VMEM((tn, dh), jnp.float32)],
        compiler_params=pltpu.CompilerParams(
            dimension_semantics=("parallel", "parallel", "parallel", "arbitrary"),
            vmem_limit_bytes=_VMEM_LIMIT),
        cost_estimate=cost,
    )(ctx, wk_h, wv_h)


def flash_attention(q, k, v, *, q_tile=256, kv_tile=512):
    """q: [B, H, Nq, dh] (pre-scaled), k/v: [B, H, Nk, dh] -> [B, H, Nq, dh]."""
    B, H, Nq, dh = q.shape
    Nk = k.shape[2]
    tq = _pick_tile(Nq, q_tile, 8)
    tkv = _pick_tile(Nk, kv_tile, 8)
    grid = (B, H, Nq // tq, Nk // tkv)
    cost = pl.CostEstimate(
        flops=4 * B * H * Nq * Nk * dh, transcendentals=B * H * Nq * Nk,
        bytes_accessed=4 * B * H * (2 * Nq * dh + 2 * Nk * dh))
    return pl.pallas_call(
        _flash_attn_kernel,
        out_shape=jax.ShapeDtypeStruct((B, H, Nq, dh), q.dtype),
        grid=grid,
        in_specs=[
            pl.BlockSpec((1, 1, tq, dh), lambda b, hd, qi, ki: (b, hd, qi, 0)),
            pl.BlockSpec((1, 1, tkv, dh), lambda b, hd, qi, ki: (b, hd, ki, 0)),
            pl.BlockSpec((1, 1, tkv, dh), lambda b, hd, qi, ki: (b, hd, ki, 0)),
        ],
        out_specs=pl.BlockSpec((1, 1, tq, dh), lambda b, hd, qi, ki: (b, hd, qi, 0)),
        scratch_shapes=[pltpu.VMEM((tq, 1), jnp.float32),     # running max
                        pltpu.VMEM((tq, 1), jnp.float32),     # running denom
                        pltpu.VMEM((tq, dh), jnp.float32)],   # output accumulator
        compiler_params=pltpu.CompilerParams(
            dimension_semantics=("parallel", "parallel", "parallel", "arbitrary"),
            vmem_limit_bytes=_VMEM_LIMIT),
        cost_estimate=cost,
    )(q, k, v)


def output_projection(o, wo_h, bo, *, seq_tile=256, out_tile=256):
    """o: [B, H, N, dh], wo_h: [H, dh, Dq], bo: [1, Dq] -> [B, N, Dq] (heads merged in-kernel)."""
    B, H, N, dh = o.shape
    Dq = wo_h.shape[2]
    tq = _pick_tile(N, seq_tile, 8)
    tn = _pick_tile(Dq, out_tile, 128)
    grid = (B, N // tq, Dq // tn, H)     # head axis is the reduction, last & arbitrary
    cost = pl.CostEstimate(
        flops=2 * B * N * H * dh * Dq, transcendentals=0,
        bytes_accessed=4 * (B * H * N * dh + H * dh * Dq + B * N * Dq))
    return pl.pallas_call(
        _merge_out_kernel,
        out_shape=jax.ShapeDtypeStruct((B, N, Dq), o.dtype),
        grid=grid,
        in_specs=[
            pl.BlockSpec((1, 1, tq, dh), lambda b, ni, j, hd: (b, hd, ni, 0)),
            pl.BlockSpec((1, dh, tn), lambda b, ni, j, hd: (hd, 0, j)),
            pl.BlockSpec((1, tn), lambda b, ni, j, hd: (0, j)),
        ],
        out_specs=pl.BlockSpec((1, tq, tn), lambda b, ni, j, hd: (b, ni, j)),
        scratch_shapes=[pltpu.VMEM((tq, tn), jnp.float32)],
        compiler_params=pltpu.CompilerParams(
            dimension_semantics=("parallel", "parallel", "parallel", "arbitrary"),
            vmem_limit_bytes=_VMEM_LIMIT),
        cost_estimate=cost,
    )(o, wo_h, bo)


# ---------------------------------------------------------------------------
# Parameters (torch-style flat init + one-time per-head repacking)
# ---------------------------------------------------------------------------
def init_attention_params(key, query_dim, context_dim=None, heads=8, dim_head=64):
    context_dim = query_dim if context_dim is None else context_dim
    inner = heads * dim_head
    k1, k2, k3, k4 = jax.random.split(key, 4)
    # Stored as [in, out] (transposed vs. torch's [out, in]) so y = x @ W (+ b).
    return {
        "heads": heads, "dim_head": dim_head,
        "wq": jax.random.normal(k1, (query_dim, inner), jnp.float32) * 0.05,
        "wkv": jax.random.normal(k2, (context_dim, 2 * inner), jnp.float32) * 0.05,
        "wo": jax.random.normal(k3, (inner, query_dim), jnp.float32) * 0.05,
        "bo": jax.random.normal(k4, (query_dim,), jnp.float32) * 0.05,
    }


def prepare_attention_params(flat):
    """One-time weight repack to per-head layouts (done once, not per forward)."""
    h, dh = flat["heads"], flat["dim_head"]
    Dq = flat["wq"].shape[0]
    Dc = flat["wkv"].shape[0]
    inner = h * dh
    wq_h = flat["wq"].reshape(Dq, h, dh).transpose(1, 0, 2)                  # [h, Dq, dh]
    wk_h = flat["wkv"][:, :inner].reshape(Dc, h, dh).transpose(1, 0, 2)      # [h, Dc, dh]
    wv_h = flat["wkv"][:, inner:].reshape(Dc, h, dh).transpose(1, 0, 2)      # [h, Dc, dh]
    wo_h = flat["wo"].reshape(h, dh, Dq)                                      # [h, dh, Dq]
    return {
        "heads": h, "dim_head": dh,
        "wq_h": wq_h, "wk_h": wk_h, "wv_h": wv_h, "wo_h": wo_h,
        "bo": flat["bo"].reshape(1, Dq),
    }


def attention_forward(params, x, context=None):
    """x: [B, Nq, query_dim], context: [B, Nk, context_dim] or None."""
    ctx = x if context is None else context
    dh = params["dim_head"]
    scale = dh ** (-0.5)
    # q = to_q(x) * scale  (scale folded into the projection, applied once)
    qh = per_head_projection(x, params["wq_h"], out_scale=scale)     # [B, h, Nq, dh]
    # k, v = to_kv(context).chunk(2, -1)  (single read of context)
    kh, vh = kv_projection(ctx, params["wk_h"], params["wv_h"])      # [B, h, Nk, dh]
    # softmax(q k^T) v, flash-style
    oh = flash_attention(qh, kh, vh)                                 # [B, h, Nq, dh]
    # to_out with in-kernel head merge + bias; drop_path is identity (rate 0.0)
    return output_projection(oh, params["wo_h"], params["bo"])       # [B, Nq, Dq]


# ---------------------------------------------------------------------------
# Pure-JAX reference (for correctness check)
# ---------------------------------------------------------------------------
def attention_reference(flat, x, context=None):
    B, Nq, Dq = x.shape
    ctx = x if context is None else context
    h, dh = flat["heads"], flat["dim_head"]
    inner = h * dh
    scale = dh ** (-0.5)
    q = x @ flat["wq"]
    kv = ctx @ flat["wkv"]
    k, v = kv[..., :inner], kv[..., inner:]

    def sh(t):
        return t.reshape(B, t.shape[1], h, dh).transpose(0, 2, 1, 3)

    q, k, v = sh(q), sh(k), sh(v)
    sim = jnp.einsum("bhid,bhjd->bhij", q, k) * scale
    attn = jax.nn.softmax(sim, axis=-1)
    out = jnp.einsum("bhij,bhjd->bhid", attn, v)
    out = out.transpose(0, 2, 1, 3).reshape(B, Nq, inner)
    return out @ flat["wo"] + flat["bo"]


if __name__ == "__main__":
    key = jax.random.PRNGKey(0)
    k_param, k_x = jax.random.split(key)

    B, N, query_dim = 2, 8, 32
    heads, dim_head = 2, 16

    flat_params = init_attention_params(
        k_param, query_dim=query_dim, heads=heads, dim_head=dim_head)
    params = prepare_attention_params(flat_params)
    x = jax.random.normal(k_x, (B, N, query_dim), jnp.float32)

    y = attention_forward(params, x)
    y = jax.block_until_ready(y)

    y_ref = attention_reference(flat_params, x)
    assert y.shape == (B, N, query_dim)
    # Tolerance slightly relaxed: epilogue uses pl.reciprocal(approx=True) on the EUP.
    assert jnp.allclose(y, y_ref, atol=2e-3, rtol=2e-3), "mismatch vs reference"

    print("KERNEL_OK")
</pallas_src>

<mosaic_0001>
module attributes {stable_mosaic.version = 11 : i64} {
  func.func @_head_proj_kernel(%arg0: i32, %arg1: i32, %arg2: i32, %arg3: i32, %arg4: memref<1x8x32xf32, #tpu.memory_space<vmem>>, %arg5: memref<1x32x16xf32, #tpu.memory_space<vmem>>, %arg6: memref<1x1x8x16xf32, #tpu.memory_space<vmem>>, %arg7: memref<8x16xf32, #tpu.memory_space<vmem>>) attributes {dimension_semantics = [#tpu.dimension_semantics<parallel>, #tpu.dimension_semantics<parallel>, #tpu.dimension_semantics<parallel>, #tpu.dimension_semantics<arbitrary>], iteration_bounds = array<i64: 2, 2, 1, 1>, scalar_prefetch = 0 : i64, scratch_operands = 1 : i64, tpu.core_type = #tpu.core_type<tc>, window_params = [{transform_indices = @transform_0, window_bounds = array<i64: 1, 8, 32>}, {transform_indices = @transform_1, window_bounds = array<i64: 1, 32, 16>}, {transform_indices = @transform_2, window_bounds = array<i64: 1, 1, 8, 16>}]} {
    %c0_i32 = arith.constant 0 : i32
    %0 = arith.cmpi eq, %arg3, %c0_i32 : i32
    %1 = arith.extui %0 : i1 to i32
    %c0_i32_0 = arith.constant 0 : i32
    %2 = arith.cmpi ne, %1, %c0_i32_0 : i32
    scf.if %2 {
      %cst_12 = arith.constant 0.000000e+00 : f32
      %14 = vector.broadcast %cst_12 : f32 to vector<8x16xf32>
      %c0_13 = arith.constant 0 : index
      %c0_14 = arith.constant 0 : index
      %15 = vector.load %arg7[%c0_13, %c0_14] : memref<8x16xf32, #tpu.memory_space<vmem>>, vector<8x16xf32>
      tpu.vector_store %arg7[%c0_13, %c0_14], %14 {strides = array<i32>} : memref<8x16xf32, #tpu.memory_space<vmem>>, vector<8x16xf32>,
    } else {
    }
    %c0 = arith.constant 0 : index
    %c0_1 = arith.constant 0 : index
    %3 = vector.load %arg7[%c0, %c0_1] : memref<8x16xf32, #tpu.memory_space<vmem>>, vector<8x16xf32>
    %c0_2 = arith.constant 0 : index
    %c0_3 = arith.constant 0 : index
    %c0_4 = arith.constant 0 : index
    %4 = vector.load %arg4[%c0_2, %c0_3, %c0_4] : memref<1x8x32xf32, #tpu.memory_space<vmem>>, vector<1x8x32xf32>
    %5 = vector.shape_cast %4 : vector<1x8x32xf32> to vector<8x32xf32>
    %c0_5 = arith.constant 0 : index
    %c0_6 = arith.constant 0 : index
    %c0_7 = arith.constant 0 : index
    %6 = vector.load %arg5[%c0_5, %c0_6, %c0_7] : memref<1x32x16xf32, #tpu.memory_space<vmem>>, vector<1x32x16xf32>
    %7 = vector.shape_cast %6 : vector<1x32x16xf32> to vector<32x16xf32>
    %cst = arith.constant dense<0.000000e+00> : vector<8x16xf32>
    %8 = tpu.matmul %5, %7, %cst {dimension_numbers = #tpu.dot_dimension_numbers<[1], [0], [0], [1], [0, 0, 1, 1], [], []>} : vector<8x32xf32>, vector<32x16xf32>, vector<8x16xf32> -> vector<8x16xf32>
    %9 = arith.addf %3, %8 : vector<8x16xf32>
    %c0_8 = arith.constant 0 : index
    %c0_9 = arith.constant 0 : index
    %10 = vector.load %arg7[%c0_8, %c0_9] : memref<8x16xf32, #tpu.memory_space<vmem>>, vector<8x16xf32>
    tpu.vector_store %arg7[%c0_8, %c0_9], %9 {strides = array<i32>} : memref<8x16xf32, #tpu.memory_space<vmem>>, vector<8x16xf32>,
    %c0_i32_10 = arith.constant 0 : i32
    %11 = arith.cmpi eq, %arg3, %c0_i32_10 : i32
    %12 = arith.extui %11 : i1 to i32
    %c0_i32_11 = arith.constant 0 : i32
    %13 = arith.cmpi ne, %12, %c0_i32_11 : i32
    scf.if %13 {
      %c0_12 = arith.constant 0 : index
      %c0_13 = arith.constant 0 : index
      %14 = vector.load %arg7[%c0_12, %c0_13] : memref<8x16xf32, #tpu.memory_space<vmem>>, vector<8x16xf32>
      %cst_14 = arith.constant 2.500000e-01 : f32
      %15 = vector.broadcast %cst_14 : f32 to vector<8x16xf32>
      %16 = arith.mulf %14, %15 : vector<8x16xf32>
      %c0_15 = arith.constant 0 : index
      %c0_16 = arith.constant 0 : index
      %c0_17 = arith.constant 0 : index
      %c0_18 = arith.constant 0 : index
      %17 = vector.load %arg6[%c0_15, %c0_16, %c0_17, %c0_18] : memref<1x1x8x16xf32, #tpu.memory_space<vmem>>, vector<1x1x8x16xf32>
      %18 = vector.shape_cast %17 : vector<1x1x8x16xf32> to vector<8x16xf32>
      %19 = vector.shape_cast %16 : vector<8x16xf32> to vector<1x1x8x16xf32>
      tpu.vector_store %arg6[%c0_15, %c0_16, %c0_17, %c0_18], %19 {strides = array<i32>} : memref<1x1x8x16xf32, #tpu.memory_space<vmem>>, vector<1x1x8x16xf32>,
    } else {
    }
    return
  }
  func.func @transform_0(%arg0: i32, %arg1: i32, %arg2: i32, %arg3: i32) -> (i32, i32, i32) {
    %c0_i32 = arith.constant 0 : i32
    return %arg0, %arg2, %arg3 : i32, i32, i32
  }
  func.func @transform_1(%arg0: i32, %arg1: i32, %arg2: i32, %arg3: i32) -> (i32, i32, i32) {
    %c0_i32 = arith.constant 0 : i32
    %c0_i32_0 = arith.constant 0 : i32
    return %arg1, %arg3, %c0_i32 : i32, i32, i32
  }
  func.func @transform_2(%arg0: i32, %arg1: i32, %arg2: i32, %arg3: i32) -> (i32, i32, i32, i32) {
    %c0_i32 = arith.constant 0 : i32
    %c0_i32_0 = arith.constant 0 : i32
    return %arg0, %arg1, %arg2, %c0_i32 : i32, i32, i32, i32
  }
}

</mosaic_0001>

<bundles_post_ra>
// kernel: tpu_custom_call.1
= control target key start
LH: loop header
LB: loop body
LE: loop exit
PB: predicated region body
PF: predicated region fallthrough
CT: control target
= control target key end

     0   :  { %7 = vsyncpa [#allocation4], 0  ;;  %s789_s0 = inlined_call_operand.vmem [shape: f32[2,8,32], index: 0, kind: input, shape index: {}]   ;;  %s790_s1 = inlined_call_operand.vmem [shape: f32[2,32,16], index: 1, kind: input, shape index: {}]   ;;  %s791_s2 = inlined_call_operand.hbm [shape: f32[2,2,8,16], index: 2, kind: output, shape index: {}]  }
   0x1   :  { %9 = vsyncpa [#allocation4 + $0x1], 0  ;;  %s659_s9 = smov 0   ;;  %s661_s10 = smov 0  }
   0x2   :  { %s663_s11 = smov 0   ;;  %s665_s12 = smov 0  }
   0x3   :  { %s667_s13 = smov 0   ;;  %s669_s14 = smov 0  }
   0x4   :  { %s671_s15 = smov 0   ;;  %s673_s16 = smov 0  }
   0x5 LB: > { %s442_s17 = sadd.s32 4294967295, %s639_s16   ;;  %s443_s18 = sadd.s32 4294967294, %s639_s16   ;;  %s639_s16 = sphi %s673_s16, %s15_s16   ;;  %s635_s15 = sphi %s671_s15, %s800_s15   ;;  %s631_s14 = sphi %s669_s14, %s799_s14   ;;  %s627_s13 = sphi %s667_s13, %s798_s13   ;;  %s623_s12 = sphi %s665_s12, %s797_s12   ;;  %s619_s11 = sphi %s663_s11, %s796_s11   ;;  %s615_s10 = sphi %s661_s10, %s795_s10   ;;  %s611_s9 = sphi %s659_s9, %s794_s9  }
   0x6   : > { %s37_s19 = sadd.s32 1, %s631_s14  ;;  %s41_s20 = sadd.s32 1, %s635_s15 }
   0x7   : > { %p39_p0 = scmp.ge.s32.totalorder %s37_s19, 2  ;;  %p120_p1 = scmp.ne.s32.totalorder %s619_s11, %s615_s10 }
   0x8   : > { %p121_p2 = scmp.eq.s32.totalorder %s442_s17, 3  ;;  %p126_p5 = scmp.ne.s32.totalorder %s615_s10, %s611_s9 }
   0x9   : > { %s802_s19 = smov (%p39_p0, %s37_s19), 0  ;;  %s804_s20 = smov (!%p39_p0, %s41_s20), %s635_s15 }
   0xa   : > { %s104_s21 = ssub.s32 %s631_s14, %s802_s19  ;;  %p710_p3 = por %p121_p2, %p120_p1 }
   0xb   : > { %p43_p4 = scmp.ge.s32.totalorder %s804_s20, 2  ;;  %p127_p6 = scmp.eq.s32.totalorder %s443_s18, 3 }
   0xc   : > { %p446_p7 = scmp.ge.s32.totalorder %s639_s16, 1  ;;  %p171_p9 = scmp.lt.s32.totalorder %s639_s16, 5 }
   0xd   : > { %s806_s20 = smov (%p43_p4, %s804_s20), 0  ;;  %p719_p8 = por %p127_p6, %p126_p5 }
   0xe   : > { %s103_s24 = ssub.s32 %s635_s15, %s806_s20  ;;  %s110_s25 = sadd.s32 1, %s619_s11 }
   0xf   : > { %s105_s26 = sor.u32 %s104_s21, %s103_s24  ;;  %p172_p10 = pnand %p446_p7, %p171_p9 }
  0x10   : > { %p108_p11 = scmp.eq.s32.totalorder %s105_s26, 0  ;;  %p218_p12 = scmp.lt.s32.totalorder (!%p172_p10), %s623_s12, 1 }
  0x11   : > { %175 = sbr.rel (%p172_p10) target bundleno = 252 (0xfc), region = 28  ;;  %p207_p13 = scmp.lt.s32.totalorder (!%p172_p10), %s627_s13, 1 }
  0x12   : > { %s728_s27 = scalar_select %p108_p11, %s619_s11, %s110_s25  }
  0x13   : > { %s204_s18 = sand.u32 (!%p172_p10), 1, %s615_s10   ;;  %s453_s24 = sshll.u32 (!%p172_p10), %s627_s13, 1 }
  0x14   : > { %s447_s21 = sshll.u32 (!%p172_p10), %s204_s18, 3  ;;  %s335_s25 = sadd.s32 (!%p172_p10), %s623_s12, %s453_s24 }
  0x15   : > { %s454_s26 = sshll.u32 (!%p172_p10), %s335_s25, 7 }
  0x16   : > { %vm231_vm0 = vcmask 130048   ;;  %v641_v0 = vmov 0.0   ;;  %vm642_vm1 = vmmov 0   ;;  %s219_s28 = scalar_select %p218_p12, %s623_s12, 1  ;;  %vm239_vm2 = vcmask 261120  }
  0x17   : > { %463 = vmatprep.subr.mxu0 %v641_v0  ;;  %471 = vmatprep.mubr.msk.f32.mxu0 %vm642_vm1, %v641_v0  ;;  %232 = vst.msk [vmem:[#allocation2] sm:$0xff] %vm231_vm0, %v641_v0  ;;  %s208_s29 = scalar_select %p207_p13, %s627_s13, 1 }
  0x18   : > { %s457_s30 = sshll.u32 %s219_s28, 5  ;;  %s206_s28 = scalar_lea.vmem [#allocation3], %s447_s21 }
  0x19   : > { %s225_s5 = scalar_lea.vmem %s790_s1, %s457_s30  ;;  %s448_s6 = sshll.u32 %s208_s29, 3 }
  0x1a   : > { %v238_v1 = vld [vmem:[%s225_s5 + $0x18] sm:$0xff]  ;;  %v237_v2 = vld [vmem:[%s225_s5 + $0x10] sm:$0xff]  ;;  %v236_v3 = vld [vmem:[%s225_s5 + $0x8] sm:$0xff]  ;;  %s216_s17 = scalar_lea.vmem %s789_s0, %s448_s6  ;;  %s339_s29 = sshll.u32 %s206_s28, 4  ;;  %s340_s29 = int_to_ptr.vmem [resolvable:$true] %s339_s29 }
  0x1b   : > { %464 = vmatpush3.msra.mxu0 %v238_v1  ;;  %v235_v4 = vld [vmem:[%s225_s5] sm:$0xff]  ;;  %s337_s4 = scalar_lea.hbm %s791_s2, %s454_s26  ;;  %s323_s5 = scalar_lea.sflag [#allocation4], %s204_s18 }
  0x1c   : > { %465 = vmatprep.subr.mxu0 %v641_v0  ;;  %v234_v5 = vld [vmem:[%s216_s17] sm:$0xff]  ;;  %s547_s6 = scalar_lea.vmem %s340_s29, 128  ;;  %s643_s13 = smov [#allocation3]  }
  0x1d   : > { %466 = vmatpush3.msra.mxu0 %v237_v2  ;;  %p548_p0 = scmp.ne.s32.totalorder %s340_s29, %s547_s6  ;;  %s551_s12 = sshll.u32 %s643_s13, 4  ;;  %s552_s12 = int_to_ptr.vmem [resolvable:$false] %s551_s12 }
  0x1e   : > { %467 = vmatprep.subr.mxu0 %v641_v0  ;;  %v233_v6 = vld [vmem:[#allocation2] sm:$0xff]  ;;  %s553_s7 = scalar_lea.vmem %s552_s12, 256  ;;  %p554_p4 = scmp.lt.s32.totalorder %s340_s29, %s552_s12 }
  0x1f   : > { %468 = vmatpush3.msra.mxu0 %v236_v3  ;;  %p549_p1 = pnand %p548_p0, %p710_p3  ;;  %p555_p5 = scmp.lt.s32.totalorder %s553_s7, %s547_s6 }
  0x20   : > { %469 = vmatprep.subr.mxu0 %v641_v0 }
  0x21   : > { %470 = vmatpush3.msra.mxu0 %v235_v4  ;;  %p550_p2 = pneg %p549_p1  ;;  %p556_p6 = por %p555_p5, %p554_p4 }
  0x22   : > { %472 = vmatmul.mubr.msk.f32.vlgmr.msra.gmra.mxu0 %vm239_vm2, %v234_v5 }
  0x23   : > { %p557_p7 = pnand %p556_p6, %p550_p2 }
  0xe2   : > { %v309_v7 = vpop.f32.mrf.mxu0 }
  0xe3   : > { %v313_v8 = vadd.f32 %v309_v7, %v233_v6 }
  0xe4   : > { %v473_v9 = vpop.f32.mrf.mxu0 }
  0xe5   : > { %315 = vst.msk [vmem:[#allocation2] sm:$0xff] %vm231_vm0, %v313_v8 }
  0xec   : > { %v319_v10 = vld [vmem:[#allocation2] sm:$0xff] }
  0xed   : > { %v320_v11 = vmul.f32 0.25, %v319_v10 }
  0xef   : > { %321 = vst.msk [vmem:[%s206_s28] sm:$0xff] %vm231_vm0, %v320_v11 }
  0xf0   : > { %560 = shalt.err (!%p557_p7)
}
  0xf1   : > { %s561_s8 = scalar_lea.hbm %s337_s4, 128  ;;  %s565_s21 = scalar_lea.hbm %s791_s2, 512 }
  0xf2   : > { %p562_p9 = scmp.ne.s32.totalorder %s337_s4, %s561_s8  ;;  %p566_p12 = scmp.lt.s32.totalorder %s337_s4, %s791_s2 }
  0xf3   : > { %p567_p13 = scmp.lt.s32.totalorder %s565_s21, %s561_s8 }
  0xf4   : > { %p563_p10 = pnand %p562_p9, %p710_p3 }
  0xf5   : > { %p568_p0 = por %p567_p13, %p566_p12 }
  0xf6   : > { %p564_p11 = pneg %p563_p10 }
  0xf8   : > { %p569_p1 = pnand %p568_p0, %p564_p11 }
  0xfa   : > { %572 = shalt.err (!%p569_p1)
}
  0xfb   : > { %474 = dma.vmem_to_hbm [thread:$0]  (%p710_p3), %s340_s29, 128, %s337_s4, %s323_s5  }
  0xfc PF: > { %p480_p2 = scmp.ge.s32.totalorder %s639_s16, 2  ;;  %s351_s26 = sand.u32 1, %s611_s9  }
  0xfd   : > { %s352_s28 = scalar_lea.sflag [#allocation4], %s351_s26 }
  0xfe   : > { %p477_p4 = pnand %p480_p2, %p719_p8 }
 0x100   : > { %p478_p5 = pneg %p477_p4 }
 0x102   : > { %606 = dma.done.wait (%p478_p5), %s352_s28, 128  }
 0x103   : > { %608 = vsyncadd (%p478_p5), %s352_s28, 4294967168  ;;  %s15_s16 = sadd.s32 1, %s639_s16   ;;  %s794_s9 = smov %s615_s10 }
 0x104   : > { %p12_p6 = scmp.ge.s32.totalorder %s15_s16, 6   ;;  %s795_s10 = smov %s619_s11 }
 0x105   : > { %s796_s11 = smov %s728_s27  ;;  %s797_s12 = smov %s631_s14 }
 0x106   : > { %s798_s13 = smov %s635_s15  ;;  %s799_s14 = smov %s802_s19 }
 0x107   : > { %s800_s15 = smov %s806_s20  ;;  %14 = sbr.rel (!%p12_p6) target bundleno = 5 (0x5), region = 74 }
 0x10c   :  { %357 = vsyncpa [#allocation4], 1 }
 0x10d   :  { %359 = vsyncpa [#allocation4 + $0x1], 1 }

</bundles_post_ra>
